<compile_context>
chip_gen: v7x
topology: tpu7x:2x2x1
jax: 0.10.0
libtpu: 0.0.40
codegen_flags: <defaults>
</compile_context>

<pallas_src>
import functools

import jax
import jax.numpy as jnp
from jax.experimental import pallas as pl
from jax.experimental.pallas import tpu as pltpu

SIGMA_EPS = 0.01
RHO_EPS = 0.01


def _softplus(v):
    # Matches torch.nn.Softplus(beta=1, threshold=20): linear above threshold.
    return jnp.where(v > 20.0, v, jnp.log1p(jnp.exp(jnp.minimum(v, 20.0))))


def gmm_params_kernel(color_ref, mu_x_ref, mu_y_ref, sigma_x_ref, sigma_y_ref,
                      rho_ref, pi_ref, scale_ref,
                      special_ref, color_out_ref, *, K, sigma_eps, rho_eps):
    # ---- color block: one tanh sweep over (C, K), one whole-ref store -------
    color_out_ref[...] = jnp.tanh(color_ref[...])

    # ---- special rows: compute each (1, K) row and store it in place --------
    special_ref[0:1, :] = jnp.tanh(mu_x_ref[...])                    # mu_x
    special_ref[1:2, :] = jnp.tanh(mu_y_ref[...])                    # mu_y
    special_ref[2:3, :] = _softplus(sigma_x_ref[...]) + sigma_eps    # sigma_x
    special_ref[3:4, :] = _softplus(sigma_y_ref[...]) + sigma_eps    # sigma_y
    special_ref[4:5, :] = jnp.tanh(rho_ref[...]) * (1.0 - rho_eps)   # rho

    # Softmax over the K components: only this row pays the XLU reduce + div.
    p = pi_ref[...]
    e = jnp.exp(p - jnp.max(p, axis=-1, keepdims=True))
    special_ref[5:6, :] = e / jnp.sum(e, axis=-1, keepdims=True)     # pi

    # sigmoid(x) = 0.5 * (1 + tanh(x / 2)) -- exact identity, rides the EUP.
    sc = jnp.broadcast_to(scale_ref[...], (1, K))
    special_ref[6:7, :] = 0.5 * (1.0 + jnp.tanh(0.5 * sc))           # scale


@functools.partial(jax.jit, static_argnames=("sigma_eps", "rho_eps"))
def gmm_parameters_forward(color_params, mu_x_params, mu_y_params,
                           sigma_x_params, sigma_y_params, rho_params,
                           pi_params, scale_params,
                           sigma_eps=SIGMA_EPS, rho_eps=RHO_EPS):
    """Inputs in PyTorch parameter shapes; outputs in PyTorch forward shapes."""
    C = color_params.shape[1]
    K = color_params.shape[-1]
    f32 = jnp.float32

    # Free metadata reshapes to lane-major 2-D (no concat / pad / HBM slab).
    color2d = color_params.reshape(C, K).astype(f32)
    rows2d = [r.reshape(1, K).astype(f32)
              for r in (mu_x_params, mu_y_params, sigma_x_params,
                        sigma_y_params, rho_params, pi_params)]
    scale2d = scale_params.reshape(1, 1).astype(f32)

    vmem = pl.BlockSpec(memory_space=pltpu.MemorySpace.VMEM)

    special, color_out = pl.pallas_call(
        functools.partial(gmm_params_kernel, K=K,
                          sigma_eps=float(sigma_eps), rho_eps=float(rho_eps)),
        out_shape=(jax.ShapeDtypeStruct((7, K), f32),
                   jax.ShapeDtypeStruct((C, K), f32)),
        in_specs=[vmem] * 8,
        out_specs=(vmem, vmem),
        compiler_params=pltpu.CompilerParams(vmem_limit_bytes=1 << 20),
        cost_estimate=pl.CostEstimate(
            flops=10 * (C + 8) * K,
            transcendentals=(C + 8) * K,
            bytes_accessed=2 * (C + 8) * K * 4),
    )(color2d, *rows2d, scale2d)

    color   = color_out.reshape(1, C, 1, 1, K)
    mu_x    = special[0].reshape(1, 1, 1, 1, K)
    mu_y    = special[1].reshape(1, 1, 1, 1, K)
    sigma_x = special[2].reshape(1, 1, 1, 1, K)
    sigma_y = special[3].reshape(1, 1, 1, 1, K)
    rho     = special[4].reshape(1, 1, 1, 1, K)
    pi      = special[5].reshape(1, 1, 1, 1, K)
    scale   = special[6, 0].reshape(1, 1, 1, 1, 1)
    return color, mu_x, mu_y, sigma_x, sigma_y, rho, pi, scale


if __name__ == "__main__":
    C, K = 4, 8
    key = jax.random.PRNGKey(0)
    ks = jax.random.split(key, 8)

    # Deterministic synthetic parameters (same shapes as the nn.Parameters).
    color_params   = jax.random.normal(ks[0], (1, C, 1, 1, K), jnp.float32)
    mu_x_params    = jax.random.normal(ks[1], (1, 1, 1, 1, K), jnp.float32)
    mu_y_params    = jax.random.normal(ks[2], (1, 1, 1, 1, K), jnp.float32)
    sigma_x_params = jax.random.normal(ks[3], (1, 1, 1, 1, K), jnp.float32)
    sigma_y_params = jax.random.normal(ks[4], (1, 1, 1, 1, K), jnp.float32)
    rho_params     = jax.random.normal(ks[5], (1, 1, 1, 1, K), jnp.float32)
    pi_params      = jax.random.normal(ks[6], (1, 1, 1, 1, K), jnp.float32)
    scale_params   = jax.random.normal(ks[7], (1, 1, 1, 1, 1), jnp.float32)

    outs = gmm_parameters_forward(color_params, mu_x_params, mu_y_params,
                                  sigma_x_params, sigma_y_params, rho_params,
                                  pi_params, scale_params)
    outs = jax.block_until_ready(outs)

    # Reference check in plain JAX.
    color_r = jnp.tanh(color_params)
    mux_r = jnp.tanh(mu_x_params)
    muy_r = jnp.tanh(mu_y_params)
    sx_r = jax.nn.softplus(sigma_x_params) + SIGMA_EPS
    sy_r = jax.nn.softplus(sigma_y_params) + SIGMA_EPS
    rho_r = jnp.tanh(rho_params) * (1.0 - RHO_EPS)
    pi_r = jax.nn.softmax(pi_params, axis=4)
    scale_r = jax.nn.sigmoid(scale_params)
    refs = (color_r, mux_r, muy_r, sx_r, sy_r, rho_r, pi_r, scale_r)

    for got, ref in zip(outs, refs):
        assert got.shape == ref.shape, (got.shape, ref.shape)
        assert jnp.allclose(got, ref, atol=1e-5, rtol=1e-5), (got, ref)

    print("KERNEL_OK")
</pallas_src>

<mosaic_0001>
module attributes {stable_mosaic.version = 11 : i64} {
  func.func @gmm_params_kernel(%arg0: memref<4x8xf32, #tpu.memory_space<vmem>>, %arg1: memref<1x8xf32, #tpu.memory_space<vmem>>, %arg2: memref<1x8xf32, #tpu.memory_space<vmem>>, %arg3: memref<1x8xf32, #tpu.memory_space<vmem>>, %arg4: memref<1x8xf32, #tpu.memory_space<vmem>>, %arg5: memref<1x8xf32, #tpu.memory_space<vmem>>, %arg6: memref<1x8xf32, #tpu.memory_space<vmem>>, %arg7: memref<1x1xf32, #tpu.memory_space<vmem>>, %arg8: memref<7x8xf32, #tpu.memory_space<vmem>>, %arg9: memref<4x8xf32, #tpu.memory_space<vmem>>) attributes {dimension_semantics = [], scalar_prefetch = 0 : i64, scratch_operands = 0 : i64, tpu.core_type = #tpu.core_type<tc>} {
    %c0 = arith.constant 0 : index
    %c0_0 = arith.constant 0 : index
    %0 = vector.load %arg0[%c0, %c0_0] : memref<4x8xf32, #tpu.memory_space<vmem>>, vector<4x8xf32>
    %1 = math.tanh %0 : vector<4x8xf32>
    %c0_1 = arith.constant 0 : index
    %c0_2 = arith.constant 0 : index
    %2 = vector.load %arg9[%c0_1, %c0_2] : memref<4x8xf32, #tpu.memory_space<vmem>>, vector<4x8xf32>
    tpu.vector_store %arg9[%c0_1, %c0_2], %1 {strides = array<i32>} : memref<4x8xf32, #tpu.memory_space<vmem>>, vector<4x8xf32>,
    %c0_3 = arith.constant 0 : index
    %c0_4 = arith.constant 0 : index
    %3 = vector.load %arg1[%c0_3, %c0_4] : memref<1x8xf32, #tpu.memory_space<vmem>>, vector<1x8xf32>
    %4 = math.tanh %3 : vector<1x8xf32>
    %c0_5 = arith.constant 0 : index
    %c0_6 = arith.constant 0 : index
    %5 = vector.load %arg8[%c0_5, %c0_6] : memref<7x8xf32, #tpu.memory_space<vmem>>, vector<1x8xf32>
    tpu.vector_store %arg8[%c0_5, %c0_6], %4 {strides = array<i32>} : memref<7x8xf32, #tpu.memory_space<vmem>>, vector<1x8xf32>,
    %c0_7 = arith.constant 0 : index
    %c0_8 = arith.constant 0 : index
    %6 = vector.load %arg2[%c0_7, %c0_8] : memref<1x8xf32, #tpu.memory_space<vmem>>, vector<1x8xf32>
    %7 = math.tanh %6 : vector<1x8xf32>
    %c1 = arith.constant 1 : index
    %c0_9 = arith.constant 0 : index
    %8 = vector.load %arg8[%c1, %c0_9] : memref<7x8xf32, #tpu.memory_space<vmem>>, vector<1x8xf32>
    tpu.vector_store %arg8[%c1, %c0_9], %7 {strides = array<i32>} : memref<7x8xf32, #tpu.memory_space<vmem>>, vector<1x8xf32>,
    %c0_10 = arith.constant 0 : index
    %c0_11 = arith.constant 0 : index
    %9 = vector.load %arg3[%c0_10, %c0_11] : memref<1x8xf32, #tpu.memory_space<vmem>>, vector<1x8xf32>
    %cst = arith.constant 2.000000e+01 : f32
    %10 = vector.broadcast %cst : f32 to vector<1x8xf32>
    %11 = arith.cmpf ogt, %9, %10 : vector<1x8xf32>
    %cst_12 = arith.constant 2.000000e+01 : f32
    %12 = vector.broadcast %cst_12 : f32 to vector<1x8xf32>
    %13 = arith.minimumf %9, %12 : vector<1x8xf32>
    %14 = math.exp %13 : vector<1x8xf32>
    %15 = math.log1p %14 : vector<1x8xf32>
    %16 = arith.select %11, %9, %15 : vector<1x8xi1>, vector<1x8xf32>
    %cst_13 = arith.constant 0.00999999977 : f32
    %17 = vector.broadcast %cst_13 : f32 to vector<1x8xf32>
    %18 = arith.addf %16, %17 : vector<1x8xf32>
    %c2 = arith.constant 2 : index
    %c0_14 = arith.constant 0 : index
    %19 = vector.load %arg8[%c2, %c0_14] : memref<7x8xf32, #tpu.memory_space<vmem>>, vector<1x8xf32>
    tpu.vector_store %arg8[%c2, %c0_14], %18 {strides = array<i32>} : memref<7x8xf32, #tpu.memory_space<vmem>>, vector<1x8xf32>,
    %c0_15 = arith.constant 0 : index
    %c0_16 = arith.constant 0 : index
    %20 = vector.load %arg4[%c0_15, %c0_16] : memref<1x8xf32, #tpu.memory_space<vmem>>, vector<1x8xf32>
    %cst_17 = arith.constant 2.000000e+01 : f32
    %21 = vector.broadcast %cst_17 : f32 to vector<1x8xf32>
    %22 = arith.cmpf ogt, %20, %21 : vector<1x8xf32>
    %cst_18 = arith.constant 2.000000e+01 : f32
    %23 = vector.broadcast %cst_18 : f32 to vector<1x8xf32>
    %24 = arith.minimumf %20, %23 : vector<1x8xf32>
    %25 = math.exp %24 : vector<1x8xf32>
    %26 = math.log1p %25 : vector<1x8xf32>
    %27 = arith.select %22, %20, %26 : vector<1x8xi1>, vector<1x8xf32>
    %cst_19 = arith.constant 0.00999999977 : f32
    %28 = vector.broadcast %cst_19 : f32 to vector<1x8xf32>
    %29 = arith.addf %27, %28 : vector<1x8xf32>
    %c3 = arith.constant 3 : index
    %c0_20 = arith.constant 0 : index
    %30 = vector.load %arg8[%c3, %c0_20] : memref<7x8xf32, #tpu.memory_space<vmem>>, vector<1x8xf32>
    tpu.vector_store %arg8[%c3, %c0_20], %29 {strides = array<i32>} : memref<7x8xf32, #tpu.memory_space<vmem>>, vector<1x8xf32>,
    %c0_21 = arith.constant 0 : index
    %c0_22 = arith.constant 0 : index
    %31 = vector.load %arg5[%c0_21, %c0_22] : memref<1x8xf32, #tpu.memory_space<vmem>>, vector<1x8xf32>
    %32 = math.tanh %31 : vector<1x8xf32>
    %cst_23 = arith.constant 9.900000e-01 : f32
    %33 = vector.broadcast %cst_23 : f32 to vector<1x8xf32>
    %34 = arith.mulf %32, %33 : vector<1x8xf32>
    %c4 = arith.constant 4 : index
    %c0_24 = arith.constant 0 : index
    %35 = vector.load %arg8[%c4, %c0_24] : memref<7x8xf32, #tpu.memory_space<vmem>>, vector<1x8xf32>
    tpu.vector_store %arg8[%c4, %c0_24], %34 {strides = array<i32>} : memref<7x8xf32, #tpu.memory_space<vmem>>, vector<1x8xf32>,
    %c0_25 = arith.constant 0 : index
    %c0_26 = arith.constant 0 : index
    %36 = vector.load %arg6[%c0_25, %c0_26] : memref<1x8xf32, #tpu.memory_space<vmem>>, vector<1x8xf32>
    %cst_27 = arith.constant dense<0xFF800000> : vector<1xf32>
    %37 = vector.multi_reduction <maximumf>, %36, %cst_27 [1] : vector<1x8xf32> to vector<1xf32>
    %38 = vector.shape_cast %37 : vector<1xf32> to vector<1x1xf32>
    %39 = vector.broadcast %38 : vector<1x1xf32> to vector<1x8xf32>
    %40 = arith.subf %36, %39 : vector<1x8xf32>
    %41 = math.exp %40 : vector<1x8xf32>
    %cst_28 = arith.constant dense<0.000000e+00> : vector<1xf32>
    %42 = vector.multi_reduction <add>, %41, %cst_28 [1] : vector<1x8xf32> to vector<1xf32>
    %43 = vector.shape_cast %42 : vector<1xf32> to vector<1x1xf32>
    %44 = vector.broadcast %43 : vector<1x1xf32> to vector<1x8xf32>
    %45 = arith.divf %41, %44 : vector<1x8xf32>
    %c5 = arith.constant 5 : index
    %c0_29 = arith.constant 0 : index
    %46 = vector.load %arg8[%c5, %c0_29] : memref<7x8xf32, #tpu.memory_space<vmem>>, vector<1x8xf32>
    tpu.vector_store %arg8[%c5, %c0_29], %45 {strides = array<i32>} : memref<7x8xf32, #tpu.memory_space<vmem>>, vector<1x8xf32>,
    %c0_30 = arith.constant 0 : index
    %c0_31 = arith.constant 0 : index
    %47 = vector.load %arg7[%c0_30, %c0_31] : memref<1x1xf32, #tpu.memory_space<vmem>>, vector<1x1xf32>
    %48 = vector.shape_cast %47 : vector<1x1xf32> to vector<1x1xf32>
    %49 = vector.broadcast %48 : vector<1x1xf32> to vector<1x8xf32>
    %cst_32 = arith.constant 5.000000e-01 : f32
    %50 = vector.broadcast %cst_32 : f32 to vector<1x8xf32>
    %51 = arith.mulf %50, %49 : vector<1x8xf32>
    %52 = math.tanh %51 : vector<1x8xf32>
    %cst_33 = arith.constant 1.000000e+00 : f32
    %53 = vector.broadcast %cst_33 : f32 to vector<1x8xf32>
    %54 = arith.addf %53, %52 : vector<1x8xf32>
    %cst_34 = arith.constant 5.000000e-01 : f32
    %55 = vector.broadcast %cst_34 : f32 to vector<1x8xf32>
    %56 = arith.mulf %55, %54 : vector<1x8xf32>
    %c6 = arith.constant 6 : index
    %c0_35 = arith.constant 0 : index
    %57 = vector.load %arg8[%c6, %c0_35] : memref<7x8xf32, #tpu.memory_space<vmem>>, vector<1x8xf32>
    tpu.vector_store %arg8[%c6, %c0_35], %56 {strides = array<i32>} : memref<7x8xf32, #tpu.memory_space<vmem>>, vector<1x8xf32>,
    return
  }
}

</mosaic_0001>

<bundles_post_ra>
// kernel: gmm_parameters_forward.1
= control target key start
LH: loop header
LB: loop body
LE: loop exit
PB: predicated region body
PF: predicated region fallthrough
CT: control target
= control target key end

     0   :  { %s297_s0 = inlined_call_operand.vmem [shape: f32[4,8], index: 0, kind: input, shape index: {}]   ;;  %s298_s1 = inlined_call_operand.vmem [shape: f32[1,8], index: 1, kind: input, shape index: {}]   ;;  %s299_s2 = inlined_call_operand.vmem [shape: f32[1,8], index: 2, kind: input, shape index: {}]   ;;  %s300_s3 = inlined_call_operand.vmem [shape: f32[1,8], index: 3, kind: input, shape index: {}]   ;;  %s301_s4 = inlined_call_operand.vmem [shape: f32[1,8], index: 4, kind: input, shape index: {}]   ;;  %s302_s5 = inlined_call_operand.vmem [shape: f32[1,8], index: 5, kind: input, shape index: {}]   ;;  %s303_s6 = inlined_call_operand.vmem [shape: f32[1,8], index: 6, kind: input, shape index: {}]   ;;  %s304_s7 = inlined_call_operand.<no memory space> [shape: f32[1,1], index: 7, kind: input, shape index: {}]   ;;  %s305_s8 = inlined_call_operand.vmem [shape: f32[7,8], index: 8, kind: output, shape index: {0}]   ;;  %s306_s9 = inlined_call_operand.hbm [shape: f32[4,8], index: 9, kind: output, shape index: {1}]  }
   0x1   :  { %v15_v0 = vstv %s304_s7 }
   0x2   :  { %16 = vst [vmem:[#allocation2] sm:$0x1] %v15_v0 }
   0x3   :  { %vm40_vm0 = vcmask 57344   ;;  %v42_v1 = vld [vmem:[%s299_s2] sm:$0x1] }
   0x4   :  { %v45_v2 = vld [vmem:[%s300_s3] sm:$0x1]  ;;  %133 = vtanh.f32 %v42_v1 }
   0x5   :  { %v47_v3 = vmin.f32 %v45_v2, 20.0  ;;  %v62_v4 = vld [vmem:[%s301_s4] sm:$0x1] }
   0x6   :  { %v79_v5 = vld [vmem:[%s302_s5] sm:$0x1]  ;;  %v64_v6 = vmin.f32 %v62_v4, 20.0 }
   0x7   :  { %135 = vtanh.f32 %v79_v5  ;;  %v83_v7 = vld [vmem:[%s303_s6] sm:$0x1]  ;;  %v48_v9 = vmul.f32 1.442695, %v47_v3 }
   0x8   :  { %v38_v8 = vld [vmem:[%s298_s1] sm:$0x1]  ;;  %v84_v10 = vsel %vm40_vm0, %v83_v7, -inf }
   0x9   :  { %137 = vtanh.f32 %v38_v8 }
   0xa   :  { %17 = vsyncpa [#allocation4], 0  ;;  %v65_v11 = vmul.f32 1.442695, %v64_v6  ;;  %85 = vmax.xlane.f32.xlu0 %v84_v10  ;;  %139 = vpow2.f32 %v48_v9  ;;  %vm46_vm2 = vcmp.gt.f32.partialorder %v45_v2, 20.0  ;;  %vm63_vm4 = vcmp.gt.f32.partialorder %v62_v4, 20.0 }
   0xb   :  { %v96_v38 = vld [vmem:[#allocation2] sm:$0x1]  ;;  %v179_v39 = vmov 0   ;;  %v102_v43 = vlaneseq  ;;  %vm36_vm5 = vcmask 60416   ;;  %s180_s30 = smov [#allocation3]  }
   0xc   :  { %141 = vpow2.f32 %v65_v11  ;;  %131 = vset.pattern.permute.xlu1 %v179_v39  ;;  %132 = vset.pattern.permute.xlu0 %v179_v39  ;;  %v34_v51 = vld [vmem:[%s297_s0] sm:$0xf]  ;;  %s119_s10 = sshll.u32 %s180_s30, 4  ;;  %s120_s10 = int_to_ptr.vmem [resolvable:$true] %s119_s10 }
   0xd   :  { %99 = vperm.xlu1 %131, %v96_v38   ;;  %v103_v44 = vshrl.u32 %v102_v43, 7  ;;  %s155_s11 = scalar_lea.vmem %s120_s10, 64  ;;  %p160_p1 = scmp.lt.s32.totalorder %s120_s10, %s120_s10 }
   0xe   :  { %v134_v12 = vpop.eup %133  ;;  %p156_p0 = scmp.ne.s32.totalorder %s120_s10, %s155_s11  ;;  %p161_p2 = scmp.lt.s32.totalorder %s155_s11, %s155_s11 }
   0xf   :  { %44 = vst.msk [vmem:[%s305_s8 + $0x1] sm:$0x1] %vm40_vm0, %v134_v12  ;;  %v104_v46 = vsub.s32 0, %v103_v44 }
  0x10   :  { %p162_p3 = por %p161_p2, %p160_p1 }
  0x11   :  { %v136_v13 = vpop.eup %135 }
  0x12   :  { %v81_v15 = vmul.f32 0.99, %v136_v13  ;;  %p163_p4 = pnand %p162_p3, %p156_p0 }
  0x13   :  { %v138_v14 = vpop.eup %137 }
  0x14   :  { %41 = vst.msk [vmem:[%s305_s8] sm:$0x1] %vm40_vm0, %v138_v14  ;;  %v140_v16 = vpop.eup %139  ;;  %82 = vst.msk [vmem:[%s305_s8 + $0x4] sm:$0x1] %vm40_vm0, %v81_v15 }
  0x15   :  { %v50_v18 = vadd.f32 1.0, %v140_v16  ;;  %v53_v20 = vmul.f32 -0.5, %v140_v16  ;;  %v56_v23 = vand.u32 2147483647, %v140_v16 }
  0x16   :  { %v142_v17 = vpop.eup %141 }
  0x17   :  { %v67_v19 = vadd.f32 1.0, %v142_v17  ;;  %143 = vlog2.f32 %v50_v18  ;;  %v70_v21 = vmul.f32 -0.5, %v142_v17  ;;  %v54_v22 = vadd.f32 1.0, %v53_v20 }
  0x18   :  { %v73_v25 = vand.u32 2147483647, %v142_v17  ;;  %vm57_vm1 = vcmp.lt.f32.partialorder %v56_v23, 0.0004427343 }
  0x19   :  { %145 = vlog2.f32 %v67_v19  ;;  %v71_v24 = vadd.f32 1.0, %v70_v21  ;;  %v55_v26 = vmul.f32 %v140_v16, %v54_v22 }
  0x1a   :  { %vm74_vm3 = vcmp.lt.f32.partialorder %v73_v25, 0.0004427343 }
  0x1b   :  { %v72_v28 = vmul.f32 %v142_v17, %v71_v24 }
  0x21   :  { %v144_v27 = vpop.eup %143 }
  0x22   :  { %v52_v30 = vmul.f32 0.6931472, %v144_v27 }
  0x23   :  { %v146_v29 = vpop.eup %145 }
  0x24   :  { %v69_v31 = vmul.f32 0.6931472, %v146_v29  ;;  %v58_v32 = vsel %vm57_vm1, %v55_v26, %v52_v30 }
  0x25   :  { %v59_v33 = vsel %vm46_vm2, %v45_v2, %v58_v32 }
  0x26   :  { %v75_v34 = vsel %vm74_vm3, %v72_v28, %v69_v31  ;;  %v60_v35 = vadd.f32 0.01, %v59_v33 }
  0x27   :  { %v76_v36 = vsel %vm63_vm4, %v62_v4, %v75_v34 }
  0x28   :  { %v77_v37 = vadd.f32 0.01, %v76_v36  ;;  %61 = vst.msk [vmem:[%s305_s8 + $0x2] sm:$0x1] %vm40_vm0, %v60_v35 }
  0x2a   :  { %78 = vst.msk [vmem:[%s305_s8 + $0x3] sm:$0x1] %vm40_vm0, %v77_v37 }
  0x8c   :  { %v100_v48 = vpop.permute.xlu1 %99 }
  0x8d   :  { %v105_v49 = vrot.slane %v100_v48, %v104_v46 }
  0x8f   :  { %v106_v50 = vmul.f32 0.5, %v105_v49 }
  0x97   :  { %v86_v40 = vpop.xlane.xlu0 %85 }
  0x98   :  { %v87_v41 = vsub.f32 %v83_v7, %v86_v40 }
  0x9a   :  { %v88_v42 = vmul.f32 1.442695, %v87_v41 }
  0x9c   :  { %147 = vpow2.f32 %v88_v42 }
  0x9d   :  { %149 = vtanh.f32 %v106_v50 }
  0x9e   :  { %151 = vtanh.f32 %v34_v51 }
  0xa6   :  { %v148_v45 = vpop.eup %147 }
  0xa7   :  { %v90_v47 = vsel %vm40_vm0, %v148_v45, 0.0  ;;  %v150_v52 = vpop.eup %149 }
  0xa8   :  { %91 = vadd.xlane.f32.xlu0 %v90_v47  ;;  %v108_v53 = vadd.f32 1.0, %v150_v52  ;;  %v152_v55 = vpop.eup %151 }
  0xa9   :  { %37 = vst.msk [vmem:[#allocation3] sm:$0xf] %vm36_vm5, %v152_v55 }
  0xaa   :  { %v109_v54 = vmul.f32 0.5, %v108_v53 }
  0xac   :  { %110 = vst.msk [vmem:[%s305_s8 + $0x6] sm:$0x1] %vm40_vm0, %v109_v54 }
  0xad   :  { %166 = shalt.err (!%p163_p4)
}
  0xae   :  { %s167_s13 = scalar_lea.hbm %s306_s9, 64 }
  0xaf   :  { %p168_p5 = scmp.ne.s32.totalorder %s306_s9, %s167_s13  ;;  %p171_p6 = scmp.lt.u32.totalorder %s167_s13, %s306_s9 }
  0xb1   :  { %p173_p7 = pnand %p171_p6, %p168_p5 }
  0xb3   :  { %176 = shalt.err (!%p173_p7)
}
  0xb4   :  { %122 = dma.vmem_to_hbm [thread:$0]  %s120_s10, 64, %s306_s9, [#allocation4]  }
 0x135   :  { %v92_v56 = vpop.xlane.xlu0 %91 }
 0x136   :  { %153 = vrcp.f32 %v92_v56 }
 0x140   :  { %v154_v57 = vpop.eup %153 }
 0x141   :  { %v94_v58 = vmul.f32 %v154_v57, %v148_v45 }
 0x143   :  { %95 = vst.msk [vmem:[%s305_s8 + $0x5] sm:$0x1] %vm40_vm0, %v94_v58 }
 0x144   :  { %177 = dma.done.wait [#allocation4], 64  }
 0x145   :  { %178 = vsyncadd [#allocation4], 4294967232 }
 0x146   :  { %128 = vsyncpa [#allocation4], 1 }

</bundles_post_ra>
